<compile_context>
chip_gen: v5e
topology: v5e:2x2
jax: 0.10.0
libtpu: 0.0.40
codegen_flags: <defaults>
</compile_context>

<pallas_src>
import functools

import jax
import jax.numpy as jnp
from jax import lax
from jax.experimental import pallas as pl
from jax.experimental.pallas import tpu as pltpu


def _vmem_estimate_bytes(bt, Cp, P, mm_bytes):
    """Rough live-VMEM model for one grid step (used to size Bt / vmem limit)."""
    q = bt * P
    return (2 * 2 * Cp * q * 4             # x + out blocks, double-buffered, f32
            + 9 * Cp * q * mm_bytes        # im2col operand feeding each dot
            + 2 * Cp * q * 4               # y1 / y2 f32 temporaries
            + 2 * Cp * 9 * Cp * mm_bytes)  # resident conv1/conv2 weights


def _pick_batch_tile(N, Cp, P, mm_bytes, budget_bytes=40 << 20, cap=16):
    """Largest divisor of N that fits the VMEM budget and keeps >= 2 grid steps
    (so v7x's two TensorCores both get work whenever N >= 2)."""
    best = 1
    for bt in range(1, min(N, cap) + 1):
        if N % bt:
            continue
        if N >= 2 and N // bt < 2:
            continue
        if _vmem_estimate_bytes(bt, Cp, P, mm_bytes) > budget_bytes:
            continue
        best = bt
    return best


def _residual_block_kernel(x_ref, w1_ref, w2_ref, out_ref, *, H, W, mm_dtype):
    # x_ref  : (1, Cp, Q)  Bt images; channels on sublanes, flat batch*spatial lanes
    # w1_ref : (Cp, 9*Cp)  conv1 weight; row = out-channel, col = (kh*3+kw)*Cp + ci
    # w2_ref : (Cp, 9*Cp)  conv2 weight; same layout
    # out_ref: (1, Cp, Q)  lane-dense output block
    Q = x_ref.shape[2]
    P = H * W

    x2d = x_ref[0]                      # (Cp, Q) f32; reused for the residual add

    # Lane-only (1, Q) coordinates, shared by both convs; shift/and when pow-2.
    q_idx = lax.broadcasted_iota(jnp.int32, (1, Q), 1)
    p_idx = (q_idx & (P - 1)) if (P & (P - 1)) == 0 else (q_idx % P)
    if (W & (W - 1)) == 0:
        row = p_idx >> (W.bit_length() - 1)
        col = p_idx & (W - 1)
    else:
        row = p_idx // W
        col = p_idx % W

    # Nine 3x3 taps: (flattened lane shift, boundary-validity mask or None).
    # The masks zero every lane whose source pixel lies outside its own image,
    # which also covers the circular-wrap / cross-image lanes of pltpu.roll below.
    taps = []
    for dh in (-1, 0, 1):
        for dw in (-1, 0, 1):
            conds = []
            if dh == -1:
                conds.append(row >= 1)
            elif dh == 1:
                conds.append(row <= H - 2)
            if dw == -1:
                conds.append(col >= 1)
            elif dw == 1:
                conds.append(col <= W - 2)
            valid = None
            for c in conds:
                valid = c if valid is None else jnp.logical_and(valid, c)
            taps.append((dh * W + dw, valid))

    def im2col(z):
        # (9*Cp, Q): XLU lane-rolled, boundary-masked copies stacked over taps.
        cols = []
        for s, valid in taps:
            shifted = z if s == 0 else pltpu.roll(z, shift=(-s) % Q, axis=1)
            if valid is not None:
                shifted = jnp.where(valid, shifted, 0.0)
            cols.append(shifted)
        # Cp is sublane-aligned, so the stack is a cheap layout op; cast only the
        # MXU operand (masking / accumulation / element-wise math stay f32).
        return jnp.concatenate(cols, axis=0).astype(mm_dtype)

    # conv1 (3x3, stride 1, pad 1, no bias) + ReLU — one MXU matmul, K = 9*Cp.
    y1 = jnp.maximum(
        jnp.dot(w1_ref[...], im2col(x2d), preferred_element_type=jnp.float32),
        0.0,
    )
    # conv2 (3x3, stride 1, pad 1, no bias) — one MXU matmul, K = 9*Cp.
    y2 = jnp.dot(w2_ref[...], im2col(y1), preferred_element_type=jnp.float32)

    # Residual add; lane-dense (Q = Bt*H*W, multiple of 128) unmasked store.
    out_ref[0] = x2d + y2


def residual_block(x_nchw, w1_oihw, w2_oihw, *, matmul_dtype=None):
    """x_nchw: (N, C, H, W) float32; weights OIHW (C, C, 3, 3) as in PyTorch."""
    N, C, H, W = x_nchw.shape
    P = H * W

    if matmul_dtype is None:
        # bf16 operands pay off once the MXU is the binding unit (C >= ~32) on
        # v6e/v7x; at toy C the kernel is VPU/XLU-bound and f32 keeps exactness.
        matmul_dtype = jnp.bfloat16 if C >= 32 else jnp.float32
    mm_bytes = jnp.dtype(matmul_dtype).itemsize
    sublane = 8 if mm_bytes == 4 else 16
    Cp = ((C + sublane - 1) // sublane) * sublane   # pad channels to sublane multiple

    Bt = _pick_batch_tile(N, Cp, P, mm_bytes)
    G = N // Bt
    Q = Bt * P

    # Zero-pad channels (padded weight rows/cols are zero, so padded output channels
    # stay exactly zero and are sliced off below).
    x_p = jnp.pad(x_nchw.astype(jnp.float32),
                  ((0, 0), (0, Cp - C), (0, 0), (0, 0)))
    # (N, Cp, H, W) -> (G, Cp, Bt*P): Bt images per grid step, flat on the lane axis.
    x_tiles = (x_p.reshape(G, Bt, Cp, P)
               .transpose(0, 2, 1, 3)
               .reshape(G, Cp, Q))

    def pack_w(w):
        wp = jnp.pad(w.astype(jnp.float32),
                     ((0, Cp - C), (0, Cp - C), (0, 0), (0, 0)))
        # OIHW -> (O, KH, KW, I) -> (Cp, 9*Cp): column = (kh*3 + kw)*Cp + ci,
        # matching the tap/channel stacking order of im2col in the kernel.
        return (jnp.transpose(wp, (0, 2, 3, 1))
                .reshape(Cp, 9 * Cp)
                .astype(matmul_dtype))

    w1 = pack_w(w1_oihw)
    w2 = pack_w(w2_oihw)

    # Explicit VMEM cap: budgeted for v7x's 64 MiB/TC (default scoped limit differs
    # per generation); actual usage at this Bt is well below the cap.
    vmem_limit = int(min(64 << 20,
                         max(16 << 20,
                             2 * _vmem_estimate_bytes(Bt, Cp, P, mm_bytes))))

    out_tiles = pl.pallas_call(
        functools.partial(_residual_block_kernel, H=H, W=W, mm_dtype=matmul_dtype),
        out_shape=jax.ShapeDtypeStruct((G, Cp, Q), jnp.float32),
        grid_spec=pltpu.PrefetchScalarGridSpec(
            num_scalar_prefetch=0,
            grid=(G,),   # kept >= 2 steps; "parallel" so megacore/v7x TCs shard it
            in_specs=[
                pl.BlockSpec((1, Cp, Q), lambda n: (n, 0, 0)),
                pl.BlockSpec((Cp, 9 * Cp), lambda n: (0, 0)),
                pl.BlockSpec((Cp, 9 * Cp), lambda n: (0, 0)),
            ],
            out_specs=pl.BlockSpec((1, Cp, Q), lambda n: (n, 0, 0)),
        ),
        compiler_params=pltpu.CompilerParams(
            dimension_semantics=("parallel",),
            vmem_limit_bytes=vmem_limit),
    )(x_tiles, w1, w2)

    # Undo the batch-on-lanes packing and the channel padding (cheap layout ops).
    out = (out_tiles.reshape(G, Cp, Bt, P)
           .transpose(0, 2, 1, 3)
           .reshape(N, Cp, H, W)[:, :C])
    return out


def _reference(x_nchw, w1_oihw, w2_oihw):
    """Pure-JAX reference (lax conv) for verification."""
    dn = jax.lax.conv_dimension_numbers(x_nchw.shape, w1_oihw.shape,
                                        ("NCHW", "OIHW", "NCHW"))
    y1 = jax.lax.conv_general_dilated(x_nchw, w1_oihw, (1, 1),
                                      ((1, 1), (1, 1)), dimension_numbers=dn)
    y1 = jnp.maximum(y1, 0.0)
    y2 = jax.lax.conv_general_dilated(y1, w2_oihw, (1, 1),
                                      ((1, 1), (1, 1)), dimension_numbers=dn)
    return x_nchw + y2


if __name__ == "__main__":
    key = jax.random.PRNGKey(0)
    kx, k1, k2 = jax.random.split(key, 3)

    N, C, H, W = 2, 4, 16, 16  # small NCHW input, in_planes = 4
    x = jax.random.normal(kx, (N, C, H, W), dtype=jnp.float32)
    # Deterministic "kaiming-ish" init for the two 3x3 conv weights (OIHW, no bias).
    w1 = jax.random.normal(k1, (C, C, 3, 3), dtype=jnp.float32) * 0.1
    w2 = jax.random.normal(k2, (C, C, 3, 3), dtype=jnp.float32) * 0.1

    out = residual_block(x, w1, w2)
    out = jax.block_until_ready(out)

    ref = _reference(x, w1, w2)
    assert out.shape == (N, C, H, W)
    assert jnp.allclose(out, ref, atol=1e-4, rtol=1e-4), "mismatch vs reference"

    print("KERNEL_OK")
</pallas_src>

<mosaic_0001>
module attributes {stable_mosaic.version = 11 : i64} {
  func.func @_residual_block_kernel(%arg0: i32, %arg1: memref<1x8x256xf32, #tpu.memory_space<vmem>>, %arg2: memref<8x72xf32, #tpu.memory_space<vmem>>, %arg3: memref<8x72xf32, #tpu.memory_space<vmem>>, %arg4: memref<1x8x256xf32, #tpu.memory_space<vmem>>) attributes {dimension_semantics = [#tpu.dimension_semantics<parallel>], iteration_bounds = array<i64: 2>, scalar_prefetch = 0 : i64, scratch_operands = 0 : i64, tpu.core_type = #tpu.core_type<tc>, window_params = [{transform_indices = @transform_0, window_bounds = array<i64: 1, 8, 256>}, {pipeline_mode = #tpu.pipeline_mode<synchronous>, transform_indices = @transform_1, window_bounds = array<i64: 8, 72>}, {pipeline_mode = #tpu.pipeline_mode<synchronous>, transform_indices = @transform_2, window_bounds = array<i64: 8, 72>}, {transform_indices = @transform_3, window_bounds = array<i64: 1, 8, 256>}]} {
    %c0 = arith.constant 0 : index
    %c0_0 = arith.constant 0 : index
    %c0_1 = arith.constant 0 : index
    %0 = vector.load %arg1[%c0, %c0_0, %c0_1] : memref<1x8x256xf32, #tpu.memory_space<vmem>>, vector<1x8x256xf32>
    %1 = vector.shape_cast %0 : vector<1x8x256xf32> to vector<8x256xf32>
    %2 = tpu.iota {dimensions = array<i32: 1>} : vector<1x256xi32>
    %c255_i32 = arith.constant 255 : i32
    %3 = vector.broadcast %c255_i32 : i32 to vector<1x256xi32>
    %4 = arith.andi %2, %3 : vector<1x256xi32>
    %c4_i32 = arith.constant 4 : i32
    %5 = vector.broadcast %c4_i32 : i32 to vector<1x256xi32>
    %6 = arith.shrsi %4, %5 : vector<1x256xi32>
    %c15_i32 = arith.constant 15 : i32
    %7 = vector.broadcast %c15_i32 : i32 to vector<1x256xi32>
    %8 = arith.andi %4, %7 : vector<1x256xi32>
    %c1_i32 = arith.constant 1 : i32
    %9 = vector.broadcast %c1_i32 : i32 to vector<1x256xi32>
    %10 = arith.cmpi sge, %6, %9 : vector<1x256xi32>
    %c1_i32_2 = arith.constant 1 : i32
    %11 = vector.broadcast %c1_i32_2 : i32 to vector<1x256xi32>
    %12 = arith.cmpi sge, %8, %11 : vector<1x256xi32>
    %13 = arith.andi %10, %12 : vector<1x256xi1>
    %c1_i32_3 = arith.constant 1 : i32
    %14 = vector.broadcast %c1_i32_3 : i32 to vector<1x256xi32>
    %15 = arith.cmpi sge, %6, %14 : vector<1x256xi32>
    %c1_i32_4 = arith.constant 1 : i32
    %16 = vector.broadcast %c1_i32_4 : i32 to vector<1x256xi32>
    %17 = arith.cmpi sge, %6, %16 : vector<1x256xi32>
    %c14_i32 = arith.constant 14 : i32
    %18 = vector.broadcast %c14_i32 : i32 to vector<1x256xi32>
    %19 = arith.cmpi sle, %8, %18 : vector<1x256xi32>
    %20 = arith.andi %17, %19 : vector<1x256xi1>
    %c1_i32_5 = arith.constant 1 : i32
    %21 = vector.broadcast %c1_i32_5 : i32 to vector<1x256xi32>
    %22 = arith.cmpi sge, %8, %21 : vector<1x256xi32>
    %c14_i32_6 = arith.constant 14 : i32
    %23 = vector.broadcast %c14_i32_6 : i32 to vector<1x256xi32>
    %24 = arith.cmpi sle, %8, %23 : vector<1x256xi32>
    %c14_i32_7 = arith.constant 14 : i32
    %25 = vector.broadcast %c14_i32_7 : i32 to vector<1x256xi32>
    %26 = arith.cmpi sle, %6, %25 : vector<1x256xi32>
    %c1_i32_8 = arith.constant 1 : i32
    %27 = vector.broadcast %c1_i32_8 : i32 to vector<1x256xi32>
    %28 = arith.cmpi sge, %8, %27 : vector<1x256xi32>
    %29 = arith.andi %26, %28 : vector<1x256xi1>
    %c14_i32_9 = arith.constant 14 : i32
    %30 = vector.broadcast %c14_i32_9 : i32 to vector<1x256xi32>
    %31 = arith.cmpi sle, %6, %30 : vector<1x256xi32>
    %c14_i32_10 = arith.constant 14 : i32
    %32 = vector.broadcast %c14_i32_10 : i32 to vector<1x256xi32>
    %33 = arith.cmpi sle, %6, %32 : vector<1x256xi32>
    %c14_i32_11 = arith.constant 14 : i32
    %34 = vector.broadcast %c14_i32_11 : i32 to vector<1x256xi32>
    %35 = arith.cmpi sle, %8, %34 : vector<1x256xi32>
    %36 = arith.andi %33, %35 : vector<1x256xi1>
    %c0_12 = arith.constant 0 : index
    %c0_13 = arith.constant 0 : index
    %37 = vector.load %arg2[%c0_12, %c0_13] : memref<8x72xf32, #tpu.memory_space<vmem>>, vector<8x72xf32>
    %c17_i32 = arith.constant 17 : i32
    %38 = tpu.dynamic_rotate %1 by %c17_i32 dim 1 : vector<8x256xf32>, i32 -> vector<8x256xf32>
    %cst = arith.constant 0.000000e+00 : f32
    %39 = vector.shape_cast %13 : vector<1x256xi1> to vector<1x256xi1>
    %40 = vector.broadcast %39 : vector<1x256xi1> to vector<8x256xi1>
    %41 = vector.broadcast %cst : f32 to vector<8x256xf32>
    %42 = arith.select %40, %38, %41 : vector<8x256xi1>, vector<8x256xf32>
    %c16_i32 = arith.constant 16 : i32
    %43 = tpu.dynamic_rotate %1 by %c16_i32 dim 1 : vector<8x256xf32>, i32 -> vector<8x256xf32>
    %cst_14 = arith.constant 0.000000e+00 : f32
    %44 = vector.shape_cast %15 : vector<1x256xi1> to vector<1x256xi1>
    %45 = vector.broadcast %44 : vector<1x256xi1> to vector<8x256xi1>
    %46 = vector.broadcast %cst_14 : f32 to vector<8x256xf32>
    %47 = arith.select %45, %43, %46 : vector<8x256xi1>, vector<8x256xf32>
    %c15_i32_15 = arith.constant 15 : i32
    %48 = tpu.dynamic_rotate %1 by %c15_i32_15 dim 1 : vector<8x256xf32>, i32 -> vector<8x256xf32>
    %cst_16 = arith.constant 0.000000e+00 : f32
    %49 = vector.shape_cast %20 : vector<1x256xi1> to vector<1x256xi1>
    %50 = vector.broadcast %49 : vector<1x256xi1> to vector<8x256xi1>
    %51 = vector.broadcast %cst_16 : f32 to vector<8x256xf32>
    %52 = arith.select %50, %48, %51 : vector<8x256xi1>, vector<8x256xf32>
    %c1_i32_17 = arith.constant 1 : i32
    %53 = tpu.dynamic_rotate %1 by %c1_i32_17 dim 1 : vector<8x256xf32>, i32 -> vector<8x256xf32>
    %cst_18 = arith.constant 0.000000e+00 : f32
    %54 = vector.shape_cast %22 : vector<1x256xi1> to vector<1x256xi1>
    %55 = vector.broadcast %54 : vector<1x256xi1> to vector<8x256xi1>
    %56 = vector.broadcast %cst_18 : f32 to vector<8x256xf32>
    %57 = arith.select %55, %53, %56 : vector<8x256xi1>, vector<8x256xf32>
    %c255_i32_19 = arith.constant 255 : i32
    %58 = tpu.dynamic_rotate %1 by %c255_i32_19 dim 1 : vector<8x256xf32>, i32 -> vector<8x256xf32>
    %cst_20 = arith.constant 0.000000e+00 : f32
    %59 = vector.shape_cast %24 : vector<1x256xi1> to vector<1x256xi1>
    %60 = vector.broadcast %59 : vector<1x256xi1> to vector<8x256xi1>
    %61 = vector.broadcast %cst_20 : f32 to vector<8x256xf32>
    %62 = arith.select %60, %58, %61 : vector<8x256xi1>, vector<8x256xf32>
    %c241_i32 = arith.constant 241 : i32
    %63 = tpu.dynamic_rotate %1 by %c241_i32 dim 1 : vector<8x256xf32>, i32 -> vector<8x256xf32>
    %cst_21 = arith.constant 0.000000e+00 : f32
    %64 = vector.shape_cast %29 : vector<1x256xi1> to vector<1x256xi1>
    %65 = vector.broadcast %64 : vector<1x256xi1> to vector<8x256xi1>
    %66 = vector.broadcast %cst_21 : f32 to vector<8x256xf32>
    %67 = arith.select %65, %63, %66 : vector<8x256xi1>, vector<8x256xf32>
    %c240_i32 = arith.constant 240 : i32
    %68 = tpu.dynamic_rotate %1 by %c240_i32 dim 1 : vector<8x256xf32>, i32 -> vector<8x256xf32>
    %cst_22 = arith.constant 0.000000e+00 : f32
    %69 = vector.shape_cast %31 : vector<1x256xi1> to vector<1x256xi1>
    %70 = vector.broadcast %69 : vector<1x256xi1> to vector<8x256xi1>
    %71 = vector.broadcast %cst_22 : f32 to vector<8x256xf32>
    %72 = arith.select %70, %68, %71 : vector<8x256xi1>, vector<8x256xf32>
    %c239_i32 = arith.constant 239 : i32
    %73 = tpu.dynamic_rotate %1 by %c239_i32 dim 1 : vector<8x256xf32>, i32 -> vector<8x256xf32>
    %cst_23 = arith.constant 0.000000e+00 : f32
    %74 = vector.shape_cast %36 : vector<1x256xi1> to vector<1x256xi1>
    %75 = vector.broadcast %74 : vector<1x256xi1> to vector<8x256xi1>
    %76 = vector.broadcast %cst_23 : f32 to vector<8x256xf32>
    %77 = arith.select %75, %73, %76 : vector<8x256xi1>, vector<8x256xf32>
    %78 = tpu.concatenate %42, %47, %52, %57, %1, %62, %67, %72, %77 in 0 : vector<8x256xf32>, vector<8x256xf32>, vector<8x256xf32>, vector<8x256xf32>, vector<8x256xf32>, vector<8x256xf32>, vector<8x256xf32>, vector<8x256xf32>, vector<8x256xf32> -> vector<72x256xf32>
    %cst_24 = arith.constant dense<0.000000e+00> : vector<8x256xf32>
    %79 = tpu.matmul %37, %78, %cst_24 {dimension_numbers = #tpu.dot_dimension_numbers<[1], [0], [0], [1], [0, 0, 1, 1], [], []>} : vector<8x72xf32>, vector<72x256xf32>, vector<8x256xf32> -> vector<8x256xf32>
    %cst_25 = arith.constant 0.000000e+00 : f32
    %80 = vector.broadcast %cst_25 : f32 to vector<8x256xf32>
    %81 = arith.maximumf %79, %80 : vector<8x256xf32>
    %c0_26 = arith.constant 0 : index
    %c0_27 = arith.constant 0 : index
    %82 = vector.load %arg3[%c0_26, %c0_27] : memref<8x72xf32, #tpu.memory_space<vmem>>, vector<8x72xf32>
    %c17_i32_28 = arith.constant 17 : i32
    %83 = tpu.dynamic_rotate %81 by %c17_i32_28 dim 1 : vector<8x256xf32>, i32 -> vector<8x256xf32>
    %cst_29 = arith.constant 0.000000e+00 : f32
    %84 = vector.shape_cast %13 : vector<1x256xi1> to vector<1x256xi1>
    %85 = vector.broadcast %84 : vector<1x256xi1> to vector<8x256xi1>
    %86 = vector.broadcast %cst_29 : f32 to vector<8x256xf32>
    %87 = arith.select %85, %83, %86 : vector<8x256xi1>, vector<8x256xf32>
    %c16_i32_30 = arith.constant 16 : i32
    %88 = tpu.dynamic_rotate %81 by %c16_i32_30 dim 1 : vector<8x256xf32>, i32 -> vector<8x256xf32>
    %cst_31 = arith.constant 0.000000e+00 : f32
    %89 = vector.shape_cast %15 : vector<1x256xi1> to vector<1x256xi1>
    %90 = vector.broadcast %89 : vector<1x256xi1> to vector<8x256xi1>
    %91 = vector.broadcast %cst_31 : f32 to vector<8x256xf32>
    %92 = arith.select %90, %88, %91 : vector<8x256xi1>, vector<8x256xf32>
    %c15_i32_32 = arith.constant 15 : i32
    %93 = tpu.dynamic_rotate %81 by %c15_i32_32 dim 1 : vector<8x256xf32>, i32 -> vector<8x256xf32>
    %cst_33 = arith.constant 0.000000e+00 : f32
    %94 = vector.shape_cast %20 : vector<1x256xi1> to vector<1x256xi1>
    %95 = vector.broadcast %94 : vector<1x256xi1> to vector<8x256xi1>
    %96 = vector.broadcast %cst_33 : f32 to vector<8x256xf32>
    %97 = arith.select %95, %93, %96 : vector<8x256xi1>, vector<8x256xf32>
    %c1_i32_34 = arith.constant 1 : i32
    %98 = tpu.dynamic_rotate %81 by %c1_i32_34 dim 1 : vector<8x256xf32>, i32 -> vector<8x256xf32>
    %cst_35 = arith.constant 0.000000e+00 : f32
    %99 = vector.shape_cast %22 : vector<1x256xi1> to vector<1x256xi1>
    %100 = vector.broadcast %99 : vector<1x256xi1> to vector<8x256xi1>
    %101 = vector.broadcast %cst_35 : f32 to vector<8x256xf32>
    %102 = arith.select %100, %98, %101 : vector<8x256xi1>, vector<8x256xf32>
    %c255_i32_36 = arith.constant 255 : i32
    %103 = tpu.dynamic_rotate %81 by %c255_i32_36 dim 1 : vector<8x256xf32>, i32 -> vector<8x256xf32>
    %cst_37 = arith.constant 0.000000e+00 : f32
    %104 = vector.shape_cast %24 : vector<1x256xi1> to vector<1x256xi1>
    %105 = vector.broadcast %104 : vector<1x256xi1> to vector<8x256xi1>
    %106 = vector.broadcast %cst_37 : f32 to vector<8x256xf32>
    %107 = arith.select %105, %103, %106 : vector<8x256xi1>, vector<8x256xf32>
    %c241_i32_38 = arith.constant 241 : i32
    %108 = tpu.dynamic_rotate %81 by %c241_i32_38 dim 1 : vector<8x256xf32>, i32 -> vector<8x256xf32>
    %cst_39 = arith.constant 0.000000e+00 : f32
    %109 = vector.shape_cast %29 : vector<1x256xi1> to vector<1x256xi1>
    %110 = vector.broadcast %109 : vector<1x256xi1> to vector<8x256xi1>
    %111 = vector.broadcast %cst_39 : f32 to vector<8x256xf32>
    %112 = arith.select %110, %108, %111 : vector<8x256xi1>, vector<8x256xf32>
    %c240_i32_40 = arith.constant 240 : i32
    %113 = tpu.dynamic_rotate %81 by %c240_i32_40 dim 1 : vector<8x256xf32>, i32 -> vector<8x256xf32>
    %cst_41 = arith.constant 0.000000e+00 : f32
    %114 = vector.shape_cast %31 : vector<1x256xi1> to vector<1x256xi1>
    %115 = vector.broadcast %114 : vector<1x256xi1> to vector<8x256xi1>
    %116 = vector.broadcast %cst_41 : f32 to vector<8x256xf32>
    %117 = arith.select %115, %113, %116 : vector<8x256xi1>, vector<8x256xf32>
    %c239_i32_42 = arith.constant 239 : i32
    %118 = tpu.dynamic_rotate %81 by %c239_i32_42 dim 1 : vector<8x256xf32>, i32 -> vector<8x256xf32>
    %cst_43 = arith.constant 0.000000e+00 : f32
    %119 = vector.shape_cast %36 : vector<1x256xi1> to vector<1x256xi1>
    %120 = vector.broadcast %119 : vector<1x256xi1> to vector<8x256xi1>
    %121 = vector.broadcast %cst_43 : f32 to vector<8x256xf32>
    %122 = arith.select %120, %118, %121 : vector<8x256xi1>, vector<8x256xf32>
    %123 = tpu.concatenate %87, %92, %97, %102, %81, %107, %112, %117, %122 in 0 : vector<8x256xf32>, vector<8x256xf32>, vector<8x256xf32>, vector<8x256xf32>, vector<8x256xf32>, vector<8x256xf32>, vector<8x256xf32>, vector<8x256xf32>, vector<8x256xf32> -> vector<72x256xf32>
    %cst_44 = arith.constant dense<0.000000e+00> : vector<8x256xf32>
    %124 = tpu.matmul %82, %123, %cst_44 {dimension_numbers = #tpu.dot_dimension_numbers<[1], [0], [0], [1], [0, 0, 1, 1], [], []>} : vector<8x72xf32>, vector<72x256xf32>, vector<8x256xf32> -> vector<8x256xf32>
    %125 = arith.addf %1, %124 : vector<8x256xf32>
    %c0_45 = arith.constant 0 : index
    %c0_46 = arith.constant 0 : index
    %c0_47 = arith.constant 0 : index
    %126 = vector.load %arg4[%c0_45, %c0_46, %c0_47] : memref<1x8x256xf32, #tpu.memory_space<vmem>>, vector<1x8x256xf32>
    %127 = vector.shape_cast %126 : vector<1x8x256xf32> to vector<8x256xf32>
    %128 = vector.shape_cast %125 : vector<8x256xf32> to vector<1x8x256xf32>
    tpu.vector_store %arg4[%c0_45, %c0_46, %c0_47], %128 {strides = array<i32>} : memref<1x8x256xf32, #tpu.memory_space<vmem>>, vector<1x8x256xf32>,
    return
  }
  func.func @transform_0(%arg0: i32) -> (i32, i32, i32) {
    %c0_i32 = arith.constant 0 : i32
    %c0_i32_0 = arith.constant 0 : i32
    %c0_i32_1 = arith.constant 0 : i32
    return %arg0, %c0_i32, %c0_i32_0 : i32, i32, i32
  }
  func.func @transform_1(%arg0: i32) -> (i32, i32) {
    %c0_i32 = arith.constant 0 : i32
    %c0_i32_0 = arith.constant 0 : i32
    %c0_i32_1 = arith.constant 0 : i32
    return %c0_i32, %c0_i32_0 : i32, i32
  }
  func.func @transform_2(%arg0: i32) -> (i32, i32) {
    %c0_i32 = arith.constant 0 : i32
    %c0_i32_0 = arith.constant 0 : i32
    %c0_i32_1 = arith.constant 0 : i32
    return %c0_i32, %c0_i32_0 : i32, i32
  }
  func.func @transform_3(%arg0: i32) -> (i32, i32, i32) {
    %c0_i32 = arith.constant 0 : i32
    %c0_i32_0 = arith.constant 0 : i32
    %c0_i32_1 = arith.constant 0 : i32
    return %arg0, %c0_i32, %c0_i32_0 : i32, i32, i32
  }
}

</mosaic_0001>

<bundles_post_ra>
// kernel: tpu_custom_call.1
= control target key start
LH: loop header
LB: loop body
LE: loop exit
PB: predicated region body
PF: predicated region fallthrough
CT: control target
= control target key end

     0   :  { %8 = vsyncpa [#allocation3], 0  ;;  %s1362_s0 = inlined_call_operand.hbm [shape: f32[2,8,256], index: 0, kind: input, shape index: {}]   ;;  %s1363_s1 = inlined_call_operand.hbm [shape: f32[8,72], index: 1, kind: input, shape index: {}]   ;;  %s1364_s2 = inlined_call_operand.hbm [shape: f32[8,72], index: 2, kind: input, shape index: {}]   ;;  %s1365_s3 = inlined_call_operand.hbm [shape: f32[2,8,256], index: 3, kind: output, shape index: {}]  }
   0x1   :  { %10 = vsyncpa [#allocation3 + $0x1], 0 }
   0x2   :  { %11 = vsyncpa [#allocation6], 0 }
   0x3   :  { %12 = vsyncpa [#allocation4], 0 }
   0x4   :  { %14 = vsyncpa [#allocation4 + $0x1], 0  ;;  %s937_s12 = smov 0   ;;  %s939_s13 = smov 0  }
   0x5   :  { %s941_s14 = smov 0   ;;  %s943_s15 = smov 0  }
   0x6 LB: > { %s958_s16 = sadd.s32 4294967295, %s905_s15   ;;  %s614_s17 = sadd.s32 4294967294, %s905_s15   ;;  %s905_s15 = sphi %s943_s15, %s1420_s15   ;;  %s901_s14 = sphi %s941_s14, %s1419_s14   ;;  %s897_s13 = sphi %s939_s13, %s1418_s13   ;;  %s893_s12 = sphi %s937_s12, %s1417_s12  }
   0x7   : > { %p40_p0 = scmp.ne.s32.totalorder %s897_s13, %s893_s12  ;;  %p41_p1 = scmp.eq.s32.totalorder %s958_s16, 0 }
   0x8   : > { %p106_p2 = scmp.eq.s32.totalorder %s958_s16, 1  ;;  %p112_p3 = scmp.eq.s32.totalorder %s614_s17, 1 }
   0x9   : > { %p967_p4 = por %p41_p1, %p40_p0  ;;  %p615_p5 = scmp.ge.s32.totalorder %s905_s15, 1 }
   0xa   : > { %p972_p6 = por %p112_p3, %p40_p0  ;;  %p119_p7 = scmp.lt.s32.totalorder %s905_s15, 3 }
   0xb   : > { %s131_s22 = sshll.u32 %s1363_s1, 4  ;;  %s907_s24 = smov [#allocation5]   ;;  %s132_s22 = int_to_ptr.hbm [resolvable:$true] %s131_s22 }
   0xc   : > { %p980_p8 = pnand %p615_p5, %p119_p7  ;;  %s133_s25 = sshll.u32 %s907_s24, 4  ;;  %s134_s25 = int_to_ptr.vmem [resolvable:$true] %s133_s25 }
   0xd   : > { %s143_s28 = sshll.u32 %s1364_s2, 4  ;;  %s908_s29 = smov [#allocation7]   ;;  %s144_s28 = int_to_ptr.hbm [resolvable:$true] %s143_s28 }
   0xe   : > { %p682_p10 = pneg %p980_p8  ;;  %s145_s30 = sshll.u32 %s908_s29, 4  ;;  %s146_s30 = int_to_ptr.vmem [resolvable:$true] %s145_s30 }
   0xf   : > { %s993_s4 = sadd.s32 1, %s905_s15   ;;  %s27_s5 = sadd.s32 1, %s901_s14 }
  0x10   : > { %p683_p11 = pnand %p682_p10, %p41_p1  ;;  %s24_s6 = ssub.s32 %s905_s15, %s993_s4 }
  0x11   : > { %p34_p12 = scmp.ne.s32.totalorder %s901_s14, %s897_s13  ;;  %p25_p13 = scmp.eq.s32.totalorder %s24_s6, 0 }
  0x12   : > { %685 = dma.hbm_to_vmem [thread:$0]  (!%p683_p11), %s132_s22, 128, %s134_s25, [#allocation6]  }
  0x13   : > { %688 = dma.hbm_to_vmem [thread:$0]  (!%p683_p11), %s144_s28, 128, %s146_s30, [#allocation6]  }
  0x14   : > { %p35_p0 = scmp.eq.s32.totalorder %s905_s15, 0  ;;  %p1003_p3 = por %p106_p2, %p34_p12 }
  0x15   : > { %p699_p5 = scmp.lt.s32.totalorder %s905_s15, 2  ;;  %s156_s9 = sand.u32 1, %s901_s14  }
  0x16   : > { %s1009_s8 = scalar_select %p25_p13, %s901_s14, %s27_s5  }
  0x17   : > { %p36_p7 = por %p35_p0, %p34_p12  ;;  %s619_s10 = sshll.u32 %s156_s9, 4 }
  0x18   : > { %s668_s11 = sshll.u32 %s905_s15, 4  ;;  %s160_s22 = scalar_lea.vmem [#allocation2], %s619_s10 }
  0x19   : > { %s165_s21 = scalar_lea.hbm %s1362_s0, %s668_s11  ;;  %s169_s24 = sshll.u32 %s160_s22, 4  ;;  %s170_s24 = int_to_ptr.vmem [resolvable:$true] %s169_s24 }
  0x1a   : > { %s167_s25 = sshll.u32 %s165_s21, 4  ;;  %p1016_p2 = pnand %p699_p5, %p36_p7  ;;  %s168_s25 = int_to_ptr.hbm [resolvable:$true] %s167_s25 }
  0x1b   : > { %s157_s27 = scalar_lea.sflag [#allocation3], %s156_s9  ;;  %s805_s28 = sshra.s32 %s168_s25, 4  ;;  %s806_s28 = int_to_ptr.hbm [resolvable:$true] %s805_s28 }
  0x1c   : > { %s807_s29 = scalar_lea.hbm %s806_s28, 16  ;;  %p809_p11 = pneg %p1016_p2 }
  0x1d   : > { %p808_p10 = scmp.ne.s32.totalorder %s806_s28, %s807_s29  ;;  %s812_s6 = scalar_lea.hbm %s1362_s0, 32 }
  0x1e   : > { %p813_p0 = scmp.lt.s32.totalorder %s806_s28, %s1362_s0  ;;  %p814_p5 = scmp.lt.s32.totalorder %s812_s6, %s807_s29 }
  0x1f   : > { %p810_p12 = pnand %p809_p11, %p808_p10 }
  0x20   : > { %p815_p7 = por %p814_p5, %p813_p0 }
  0x21   : > { %p811_p13 = pneg %p810_p12 }
  0x23   : > { %p816_p9 = pnand %p815_p7, %p811_p13 }
  0x25   : > { %819 = shalt.err (!%p816_p9)
}
  0x26   : > { %692 = dma.hbm_to_vmem [thread:$0]  (!%p1016_p2), %s168_s25, 256, %s170_s24, %s157_s27  }
  0x27   : > { %178 = sbr.rel (%p980_p8) target bundleno = 628 (0x274), region = 32  ;;  %s1033_s9 = sand.u32 (!%p980_p8), 1, %s897_s13  }
  0x28   : > { %s623_s17 = sshll.u32 (!%p980_p8), %s1033_s9, 4  ;;  %s181_s20 = scalar_lea.sflag (!%p980_p8), [#allocation3], %s1033_s9 }
  0x29   : > { %s184_s21 = scalar_lea.vmem (!%p980_p8), [#allocation2], %s623_s17 }
  0x2c   : > { %880 = dma.done.wait (%p967_p4), %s181_s20, 256  }
  0x2d   : > { %882 = vsyncadd (%p967_p4), %s181_s20, 4294967040 }
  0x2e   : > { %884 = dma.done.wait (%p41_p1), [#allocation6], 256  }
  0x2f   : > { %886 = vsyncadd (%p41_p1), [#allocation6], 4294967040  ;;  %v1047_v0 = vld [vmem:[%s184_s21] sm:$0xff]  ;;  %s909_s23 = smov 112   ;;  %s910_s22 = smov 111   ;;  %v1055_v1 = vld [vmem:[%s184_s21 + $0x8] sm:$0xff]  ;;  %v220_v2 = vlaneseq }
  0x30   : > { %324 = vrot.lane.b32.xlu1 %v1047_v0, %s909_s23  ;;  %337 = vrot.lane.b32.xlu0 %v1047_v0, %s910_s22  ;;  %s911_s24 = smov 113   ;;  %s912_s18 = smov 127   ;;  %v245_v49 = vld [vmem:[#allocation5] sm:$0xff] }
  0x31   : > { %311 = vrot.lane.b32.xlu2 %v1047_v0, %s911_s24  ;;  %s913_s25 = smov 1   ;;  %s914_s26 = smov 15   ;;  %v1083_v3 = vand.u32 127, %v220_v2 }
  0x32   : > { %s915_s27 = smov 16   ;;  %s916_s28 = smov 17  }
  0x33   : > { %v222_v4 = vadd.s32 128, %v1083_v3  ;;  %v223_v6 = vand.u32 255, %v1083_v3  ;;  %vm341_vm5 = vcmp.lt.s32.totalorder %v1083_v3, 111  ;;  %vm328_vm8 = vcmp.lt.s32.totalorder %v1083_v3, 112  ;;  %s669_s29 = sshll.u32 %s958_s16, 4  ;;  %s217_s10 = scalar_lea.vmem [#allocation8], %s623_s17 }
  0x34   : > { %vm1366_vm11 = vcmp.lt.s32.totalorder %v1083_v3, 113  ;;  %vm1368_vm13 = vcmp.lt.s32.totalorder %v1083_v3, 127  ;;  %vm1370_vm15 = vcmp.lt.s32.totalorder %v1083_v3, 1  ;;  %s520_s6 = scalar_lea.hbm %s1365_s3, %s669_s29  ;;  %s522_s11 = sshll.u32 %s217_s10, 4  ;;  %s523_s11 = int_to_ptr.vmem [resolvable:$true] %s522_s11 }
  0x35   : > { %v224_v7 = vand.u32 255, %v222_v4  ;;  %v1087_v8 = vshra.s32 %v223_v6, 4  ;;  %v1089_v9 = vand.u32 15, %v223_v6  ;;  %s524_s20 = sshll.u32 %s520_s6, 4  ;;  %s509_s16 = scalar_lea.sflag [#allocation4], %s1033_s9  ;;  %s525_s20 = int_to_ptr.hbm [resolvable:$true] %s524_s20 }
  0x36   : > { %s849_s21 = sshra.s32 %s525_s20, 4  ;;  %s850_s21 = int_to_ptr.hbm [resolvable:$true] %s849_s21 }
  0x37   : > { %v1091_v12 = vshra.s32 %v224_v7, 4  ;;  %v1093_v13 = vand.u32 15, %v224_v7  ;;  %vm1374_vm0 = vcmp.le.s32.totalorder %v1089_v9, 14  ;;  %vm1369_vm1 = vcmp.le.s32.totalorder %v1087_v8, 14  ;;  %p856_p9 = scmp.lt.s32.totalorder %s850_s21, %s1365_s3 }
  0x38   : > { %326 = vrot.lane.b32.xlu1 %v1055_v1, %s909_s23  ;;  %339 = vrot.lane.b32.xlu0 %v1055_v1, %s910_s22  ;;  %vm1103_vm4 = vmand %vm1369_vm1, %vm1374_vm0  ;;  %vm231_vm7 = vcmp.ge.s32.totalorder %v1089_v9, 1  ;;  %vm229_vm14 = vcmp.ge.s32.totalorder %v1087_v8, 1 }
  0x39   : > { %313 = vrot.lane.b32.xlu2 %v1055_v1, %s911_s24  ;;  %vm1372_vm2 = vcmp.le.s32.totalorder %v1093_v13, 14  ;;  %vm1367_vm3 = vcmp.le.s32.totalorder %v1091_v12, 14  ;;  %vm232_vm9 = vcmp.ge.s32.totalorder %v1093_v13, 1  ;;  %vm1131_vm10 = vmand %vm1369_vm1, %vm231_vm7 }
  0x3a   : > { %vm1112_vm6 = vmand %vm1367_vm3, %vm1372_vm2 }
  0x3b   : > { %vm1144_vm12 = vmand %vm1367_vm3, %vm232_vm9 }
  0x40   : > { %300 = vrot.lane.b32.xlu1 %v1055_v1, %s912_s18  ;;  %298 = vrot.lane.b32.xlu0 %v1047_v0, %s912_s18 }
  0x41   : > { %285 = vrot.lane.b32.xlu2 %v1047_v0, %s913_s25 }
  0x48   : > { %272 = vrot.lane.b32.xlu1 %v1047_v0, %s914_s26  ;;  %287 = vrot.lane.b32.xlu0 %v1055_v1, %s913_s25 }
  0x49   : > { %274 = vrot.lane.b32.xlu2 %v1055_v1, %s914_s26 }
  0x50   : > { %261 = vrot.lane.b32.xlu1 %v1055_v1, %s915_s27  ;;  %259 = vrot.lane.b32.xlu0 %v1047_v0, %s915_s27 }
  0x51   : > { %246 = vrot.lane.b32.xlu2 %v1047_v0, %s916_s28 }
  0x58   : > { %248 = vrot.lane.b32.xlu0 %v1055_v1, %s916_s28 }
  0x8b   : > { %v312_v5 = vpop.permute.xlu2 %311 }
  0x93   : > { %v314_v14 = vpop.permute.xlu2 %313 }
  0x94   : > { %v316_v26 = vsel %vm1366_vm11, %v312_v5, %v314_v14  ;;  %v317_v27 = vsel %vm1366_vm11, %v314_v14, %v312_v5  ;;  %vm1371_vm11 = vcmp.lt.s32.totalorder %v1083_v3, 15 }
  0x9b   : > { %v286_v25 = vpop.permute.xlu2 %285 }
  0xa2   : > { %v325_v10 = vpop.permute.xlu1 %324  ;;  %v338_v11 = vpop.permute.xlu0 %337 }
  0xa3   : > { %v275_v32 = vpop.permute.xlu2 %274 }
  0xaa   : > { %v327_v17 = vpop.permute.xlu1 %326  ;;  %v340_v18 = vpop.permute.xlu0 %339 }
  0xab   : > { %v342_v19 = vsel %vm341_vm5, %v338_v11, %v340_v18  ;;  %v343_v20 = vsel %vm341_vm5, %v340_v18, %v338_v11  ;;  %v329_v22 = vsel %vm328_vm8, %v325_v10, %v327_v17  ;;  %v330_v23 = vsel %vm328_vm8, %v327_v17, %v325_v10  ;;  %v247_v45 = vpop.permute.xlu2 %246 }
  0xac   : > { %627 = vmatpush.msk.msra.mxu0 %vm1103_vm4, %v342_v19  ;;  %636 = vmatpush.msk.msra.mxu1 %vm1112_vm6, %v343_v20 }
  0xae   : > { %628 = vmatpush.msk.msra.mxu0 %vm1369_vm1, %v329_v22  ;;  %637 = vmatpush.msk.msra.mxu1 %vm1367_vm3, %v330_v23  ;;  %vm230_vm3 = vcmp.ge.s32.totalorder %v1091_v12, 1 }
  0xaf   : > { %vm1193_vm1 = vmand %vm230_vm3, %vm1372_vm2 }
  0xb0   : > { %629 = vmatpush.msk.msra.mxu0 %vm1131_vm10, %v316_v26  ;;  %638 = vmatpush.msk.msra.mxu1 %vm1144_vm12, %v317_v27  ;;  %v396_v27 = vld [vmem:[#allocation7] sm:$0xff] }
  0xb2   : > { %v301_v28 = vpop.permute.xlu1 %300  ;;  %v299_v29 = vpop.permute.xlu0 %298 }
  0xb3   : > { %v303_v30 = vsel %vm1368_vm13, %v299_v29, %v301_v28  ;;  %v304_v31 = vsel %vm1368_vm13, %v301_v28, %v299_v29  ;;  %vm1179_vm13 = vmand %vm229_vm14, %vm1374_vm0 }
  0xb4   : > { %630 = vmatpush.msk.msra.mxu0 %vm1374_vm0, %v303_v30  ;;  %639 = vmatpush.msk.msra.mxu1 %vm1372_vm2, %v304_v31  ;;  %vm1376_vm2 = vcmp.lt.s32.totalorder %v1083_v3, 17  ;;  %vm1375_vm0 = vcmask 588800  }
  0xb6   : > { %365 = vmatpush.msra.mxu0 %v1047_v0  ;;  %385 = vmatpush.msra.mxu1 %v1055_v1 }
  0xba   : > { %v273_v33 = vpop.permute.xlu1 %272  ;;  %v288_v34 = vpop.permute.xlu0 %287 }
  0xbb   : > { %v291_v36 = vsel %vm1370_vm15, %v288_v34, %v286_v25  ;;  %v290_v37 = vsel %vm1370_vm15, %v286_v25, %v288_v34  ;;  %v278_v38 = vsel %vm1371_vm11, %v275_v32, %v273_v33  ;;  %v277_v40 = vsel %vm1371_vm11, %v273_v33, %v275_v32  ;;  %vm1220_vm11 = vmand %vm229_vm14, %vm231_vm7 }
  0xbc   : > { %631 = vmatpush.msk.msra.mxu0 %vm231_vm7, %v291_v36  ;;  %640 = vmatpush.msk.msra.mxu1 %vm232_vm9, %v290_v37  ;;  %vm1373_vm15 = vcmp.lt.s32.totalorder %v1083_v3, 16 }
  0xbe   : > { %632 = vmatpush.msk.msra.mxu0 %vm1179_vm13, %v278_v38  ;;  %641 = vmatpush.msk.msra.mxu1 %vm1193_vm1, %v277_v40 }
  0xc2   : > { %v262_v41 = vpop.permute.xlu1 %261  ;;  %v260_v42 = vpop.permute.xlu0 %259 }
  0xc3   : > { %v265_v43 = vsel %vm1373_vm15, %v262_v41, %v260_v42  ;;  %v264_v44 = vsel %vm1373_vm15, %v260_v42, %v262_v41  ;;  %vm1229_vm15 = vmand %vm230_vm3, %vm232_vm9 }
  0xc4   : > { %633 = vmatpush.msk.msra.mxu0 %vm229_vm14, %v265_v43  ;;  %642 = vmatpush.msk.msra.mxu1 %vm230_vm3, %v264_v44 }
  0xca   : > { %v249_v48 = vpop.permute.xlu0 %248 }
  0xcb   : > { %v252_v50 = vsel %vm1376_vm2, %v249_v48, %v247_v45  ;;  %v251_v51 = vsel %vm1376_vm2, %v247_v45, %v249_v48  ;;  %vm1400_vm2 = vcmp.lt.s32.totalorder %v1083_v3, 113 }
  0xcc   : > { %634 = vmatpush.msk.msra.mxu0 %vm1220_vm11, %v252_v50  ;;  %643 = vmatpush.msk.msra.mxu1 %vm1229_vm15, %v251_v51 }
  0xcd   : > { %635 = vmatmul.msk.f32.vlgmr.msra.gmra.mxu0 %vm1375_vm0, %v245_v49  ;;  %644 = vmatmul.msk.f32.vlgmr.msra.gmra.mxu1 %vm1375_vm0, %v245_v49  ;;  %vm1398_vm0 = vcmp.le.s32.totalorder %v1087_v8, 14 }
 0x14a   : > { %v371_v52 = vpop.f32.mrf.mxu0  ;;  %v391_v53 = vpop.f32.mrf.mxu1 }
 0x14b   : > { %v394_v54 = vmax.f32 %v371_v52, 0.0  ;;  %v395_v55 = vmax.f32 %v391_v53, 0.0 }
 0x14d   : > { %445 = vrot.lane.b32.xlu0 %v394_v54, %s909_s23  ;;  %453 = vrot.lane.b32.xlu1 %v394_v54, %s910_s22 }
 0x14e   : > { %455 = vrot.lane.b32.xlu2 %v395_v55, %s910_s22 }
 0x155   : > { %439 = vrot.lane.b32.xlu0 %v395_v55, %s911_s24  ;;  %447 = vrot.lane.b32.xlu1 %v395_v55, %s909_s23  ;;  %s851_s23 = scalar_lea.hbm %s850_s21, 16 }
 0x156   : > { %437 = vrot.lane.b32.xlu2 %v394_v54, %s911_s24  ;;  %p852_p1 = scmp.ne.s32.totalorder %s850_s21, %s851_s23  ;;  %s855_s24 = scalar_lea.hbm %s1365_s3, 32 }
 0x157   : > { %p857_p2 = scmp.lt.s32.totalorder %s855_s24, %s851_s23 }
 0x158   : > { %p853_p4 = pnand %p852_p1, %p1003_p3 }
 0x159   : > { %p858_p10 = por %p857_p2, %p856_p9 }
 0x15a   : > { %p854_p8 = pneg %p853_p4 }
 0x15c   : > { %p859_p11 = pnand %p858_p10, %p854_p8 }
 0x15d   : > { %421 = vrot.lane.b32.xlu0 %v394_v54, %s913_s25  ;;  %429 = vrot.lane.b32.xlu1 %v394_v54, %s912_s18 }
 0x15e   : > { %431 = vrot.lane.b32.xlu2 %v395_v55, %s912_s18 }
 0x165   : > { %415 = vrot.lane.b32.xlu0 %v395_v55, %s914_s26  ;;  %423 = vrot.lane.b32.xlu1 %v395_v55, %s913_s25 }
 0x166   : > { %413 = vrot.lane.b32.xlu2 %v394_v54, %s914_s26 }
 0x16d   : > { %397 = vrot.lane.b32.xlu0 %v394_v54, %s916_s28  ;;  %405 = vrot.lane.b32.xlu1 %v394_v54, %s915_s27 }
 0x16e   : > { %407 = vrot.lane.b32.xlu2 %v395_v55, %s915_s27 }
 0x175   : > { %399 = vrot.lane.b32.xlu1 %v395_v55, %s916_s28 }
 0x1a8   : > { %v456_v56 = vpop.permute.xlu2 %455 }
 0x1b0   : > { %v438_v61 = vpop.permute.xlu2 %437 }
 0x1b8   : > { %v432_v7 = vpop.permute.xlu2 %431 }
 0x1bf   : > { %v446_v57 = vpop.permute.xlu0 %445  ;;  %v454_v58 = vpop.permute.xlu1 %453 }
 0x1c0   : > { %v457_v59 = vsel %vm341_vm5, %v454_v58, %v456_v56  ;;  %v458_v60 = vsel %vm341_vm5, %v456_v56, %v454_v58  ;;  %vm1399_vm5 = vcmp.le.s32.totalorder %v1091_v12, 14  ;;  %v414_v16 = vpop.permute.xlu2 %413 }
 0x1c1   : > { %645 = vmatpush.msk.msra.mxu2 %vm1103_vm4, %v457_v59  ;;  %654 = vmatpush.msk.msra.mxu3 %vm1112_vm6, %v458_v60  ;;  %vm1401_vm4 = vmmov %vm1400_vm2 }
 0x1c7   : > { %v440_v62 = vpop.permute.xlu0 %439  ;;  %v448_v63 = vpop.permute.xlu1 %447 }
 0x1c8   : > { %v449_v2 = vsel %vm328_vm8, %v446_v57, %v448_v63  ;;  %v450_v4 = vsel %vm328_vm8, %v448_v63, %v446_v57  ;;  %v441_v5 = vsel %vm1400_vm2, %v438_v61, %v440_v62  ;;  %v442_v6 = vsel %vm1401_vm4, %v440_v62, %v438_v61  ;;  %v408_v23 = vpop.permute.xlu2 %407 }
 0x1c9   : > { %646 = vmatpush.msk.msra.mxu2 %vm1398_vm0, %v449_v2  ;;  %655 = vmatpush.msk.msra.mxu3 %vm1399_vm5, %v450_v4  ;;  %vm1402_vm0 = vcmp.lt.s32.totalorder %v1083_v3, 127  ;;  %vm1404_vm2 = vcmp.le.s32.totalorder %v1089_v9, 14  ;;  %vm1405_vm8 = vcmp.le.s32.totalorder %v1093_v13, 14  ;;  %vm1408_vm5 = vcmp.lt.s32.totalorder %v1083_v3, 15 }
 0x1ca   : > { %vm1403_vm6 = vmmov %vm1402_vm0 }
 0x1cb   : > { %647 = vmatpush.msk.msra.mxu2 %vm1131_vm10, %v441_v5  ;;  %656 = vmatpush.msk.msra.mxu3 %vm1144_vm12, %v442_v6  ;;  %vm1406_vm10 = vcmp.lt.s32.totalorder %v1083_v3, 1  ;;  %vm1409_vm4 = vmmov %vm1408_vm5 }
 0x1cc   : > { %vm1407_vm12 = vmmov %vm1406_vm10 }
 0x1cf   : > { %v422_v10 = vpop.permute.xlu0 %421  ;;  %v430_v11 = vpop.permute.xlu1 %429 }
 0x1d0   : > { %v433_v14 = vsel %vm1402_vm0, %v430_v11, %v432_v7  ;;  %v434_v15 = vsel %vm1403_vm6, %v432_v7, %v430_v11  ;;  %vm1414_vm0 = vcmask 588800  }
 0x1d1   : > { %648 = vmatpush.msk.msra.mxu2 %vm1404_vm2, %v433_v14  ;;  %657 = vmatpush.msk.msra.mxu3 %vm1405_vm8, %v434_v15 }
 0x1d3   : > { %475 = vmatpush.msra.mxu2 %v394_v54  ;;  %495 = vmatpush.msra.mxu3 %v395_v55 }
 0x1d7   : > { %v416_v17 = vpop.permute.xlu0 %415  ;;  %v424_v18 = vpop.permute.xlu1 %423 }
 0x1d8   : > { %v426_v19 = vsel %vm1406_vm10, %v424_v18, %v422_v10  ;;  %v425_v20 = vsel %vm1407_vm12, %v422_v10, %v424_v18  ;;  %v418_v21 = vsel %vm1408_vm5, %v416_v17, %v414_v16  ;;  %v417_v22 = vsel %vm1409_vm4, %v414_v16, %v416_v17 }
 0x1d9   : > { %649 = vmatpush.msk.msra.mxu2 %vm231_vm7, %v426_v19  ;;  %658 = vmatpush.msk.msra.mxu3 %vm232_vm9, %v425_v20  ;;  %vm1410_vm7 = vcmp.lt.s32.totalorder %v1083_v3, 16 }
 0x1da   : > { %vm1411_vm9 = vmmov %vm1410_vm7 }
 0x1db   : > { %650 = vmatpush.msk.msra.mxu2 %vm1179_vm13, %v418_v21  ;;  %659 = vmatpush.msk.msra.mxu3 %vm1193_vm1, %v417_v22  ;;  %vm1412_vm1 = vcmp.lt.s32.totalorder %v1083_v3, 17 }
 0x1dc   : > { %vm1413_vm13 = vmmov %vm1412_vm1 }
 0x1df   : > { %v406_v24 = vpop.permute.xlu1 %405  ;;  %v398_v25 = vpop.permute.xlu0 %397 }
 0x1e0   : > { %v410_v9 = vsel %vm1410_vm7, %v408_v23, %v406_v24  ;;  %v409_v13 = vsel %vm1411_vm9, %v406_v24, %v408_v23 }
 0x1e1   : > { %651 = vmatpush.msk.msra.mxu2 %vm229_vm14, %v410_v9  ;;  %660 = vmatpush.msk.msra.mxu3 %vm230_vm3, %v409_v13  ;;  %vm1415_vm14 = vmmov %vm1414_vm0 }
 0x1e7   : > { %v400_v26 = vpop.permute.xlu1 %399 }
 0x1e8   : > { %v402_v28 = vsel %vm1412_vm1, %v400_v26, %v398_v25  ;;  %v401_v29 = vsel %vm1413_vm13, %v398_v25, %v400_v26 }
 0x1e9   : > { %652 = vmatpush.msk.msra.mxu2 %vm1220_vm11, %v402_v28  ;;  %661 = vmatpush.msk.msra.mxu3 %vm1229_vm15, %v401_v29 }
 0x1ea   : > { %653 = vmatmul.msk.f32.vlgmr.msra.gmra.mxu2 %vm1414_vm0, %v396_v27  ;;  %662 = vmatmul.msk.f32.vlgmr.msra.gmra.mxu3 %vm1415_vm14, %v396_v27 }
 0x26d   : > { %v481_v3 = vpop.f32.mrf.mxu2  ;;  %v501_v8 = vpop.f32.mrf.mxu3 }
 0x26e   : > { %v504_v12 = vadd.f32 %v481_v3, %v1047_v0  ;;  %v505_v30 = vadd.f32 %v501_v8, %v1055_v1 }
 0x270   : > { %506 = vst [vmem:[%s217_s10] sm:$0xff] %v504_v12 }
 0x271   : > { %507 = vst [vmem:[%s217_s10 + $0x8] sm:$0xff] %v505_v30 }
 0x272   : > { %862 = shalt.err (!%p859_p11)
}
 0x273   : > { %680 = dma.vmem_to_hbm [thread:$0]  (%p1003_p3), %s523_s11, 256, %s525_s20, %s509_s16  }
 0x274 PF: > { %s536_s9 = sand.u32 1, %s893_s12   ;;  %p1416_p12 = scmp.ge.s32.totalorder %s905_s15, 2 }
 0x275   : > { %s537_s26 = scalar_lea.sflag [#allocation4], %s536_s9 }
 0x276   : > { %p694_p13 = pnand %p1416_p12, %p972_p6 }
 0x278   : > { %p695_p0 = pneg %p694_p13 }
 0x27a   : > { %888 = dma.done.wait (%p695_p0), %s537_s26, 256  }
 0x27b   : > { %890 = vsyncadd (%p695_p0), %s537_s26, 4294967040  ;;  %p17_p5 = scmp.ge.s32.totalorder %s993_s4, 4   ;;  %s1417_s12 = smov %s897_s13 }
 0x27c   : > { %s1418_s13 = smov %s901_s14  ;;  %s1419_s14 = smov %s1009_s8 }
 0x27d   : > { %s1420_s15 = smov %s993_s4  ;;  %19 = sbr.rel (!%p17_p5) target bundleno = 6 (0x6), region = 85 }
 0x282   :  { %543 = vsyncpa [#allocation3], 1 }
 0x283   :  { %545 = vsyncpa [#allocation3 + $0x1], 1 }
 0x284   :  { %546 = vsyncpa [#allocation6], 1 }
 0x285   :  { %547 = vsyncpa [#allocation4], 1 }
 0x286   :  { %549 = vsyncpa [#allocation4 + $0x1], 1 }

</bundles_post_ra>
